<compile_context>
chip_gen: v6e
topology: v6e:2x2x1
jax: 0.10.0
libtpu: 0.0.40
codegen_flags: <defaults>
</compile_context>

<pallas_src>
import jax
import jax.numpy as jnp
from jax.experimental import pallas as pl
from jax.experimental.pallas import tpu as pltpu


_LANE = 128


def _gate_kernel(x_ref, w1t_ref, w2t_ref, gate_ref, acc_ref):
    # x_ref   : (B, C, tn)  VMEM (native dtype)
    # w1t_ref : (C, C4)     VMEM (Conv1d weight, pre-transposed, squeezed k dim)
    # w2t_ref : (C4, C)     VMEM (pre-transposed)
    # gate_ref: (B, C)      VMEM f32 output (resident across the whole grid)
    # acc_ref : (B, C, 128) VMEM f32 running-max scratch
    nt = pl.program_id(0)

    @pl.when(nt == 0)
    def _init():
        acc_ref[...] = jnp.full(acc_ref.shape, -jnp.inf, dtype=acc_ref.dtype)

    # Bulk of the global max as element-wise VPU maximums over 128-lane chunks;
    # only one cross-lane (XLU) reduce at the very end of the grid.
    tn = x_ref.shape[-1]
    acc = acc_ref[...]
    for k in range(tn // _LANE):
        chunk = x_ref[:, :, k * _LANE:(k + 1) * _LANE].astype(jnp.float32)
        acc = jnp.maximum(acc, chunk)
    acc_ref[...] = acc

    @pl.when(nt == pl.num_programs(0) - 1)
    def _finalize():
        g = jnp.max(acc_ref[...], axis=-1)                       # (B, C)
        h = jnp.dot(g, w1t_ref[...].astype(jnp.float32),
                    preferred_element_type=jnp.float32)          # (B, C4)
        h = jnp.maximum(h, 0.0)                                  # ReLU
        # TODO(synk): training-mode Dropout is stochastic; identity at inference.
        z = jnp.dot(h, w2t_ref[...].astype(jnp.float32),
                    preferred_element_type=jnp.float32)          # (B, C)
        gate_ref[...] = jax.nn.sigmoid(z)


def _scale_kernel(gate_ref, x_ref, o_ref):
    # gate_ref: (B, C) f32;  x_ref/o_ref: (B, C, tn) native dtype.
    x = x_ref[...]
    gate = gate_ref[...].astype(x.dtype)
    o_ref[...] = gate[:, :, None] * x


def lab_module(x, w1, w2, *, max_tile_bytes=2 * 1024 * 1024):
    """x: (B, C, N); w1: (C//4, C); w2: (C, C//4). Returns (B, C, N)."""
    B, C, N = x.shape
    C4 = w1.shape[0]
    dsize = int(x.dtype.itemsize)

    # Pad the point dimension to a multiple of 128 so blocks stay lane-dense.
    Np = ((N + _LANE - 1) // _LANE) * _LANE
    if Np != N:
        pad_val = jnp.finfo(x.dtype).min  # never wins the max; sliced off later
        x_p = jnp.pad(x, ((0, 0), (0, 0), (0, Np - N)), constant_values=pad_val)
    else:
        x_p = x

    # Largest lane-dense tile that divides Np and keeps each (double-buffered)
    # x / out slab in the low-MiB range (safe for v7x's 64 MiB VMEM).
    tn = _LANE
    for cand in (1024, 512, 256, 128):
        if Np % cand == 0 and B * C * cand * dsize <= max_tile_bytes:
            tn = cand
            break
    num_tiles = Np // tn

    # Pre-transpose the 1x1-conv weights so no transpose happens in-kernel.
    w1t = jnp.transpose(w1)   # (C, C4)
    w2t = jnp.transpose(w2)   # (C4, C)

    vmem_limit = 32 * 1024 * 1024

    # Pass 1: pipelined max-reduce over N tiles + tiny gating MLP.
    gate = pl.pallas_call(
        _gate_kernel,
        out_shape=jax.ShapeDtypeStruct((B, C), jnp.float32),
        grid_spec=pltpu.PrefetchScalarGridSpec(
            num_scalar_prefetch=0,
            grid=(num_tiles,),
            in_specs=[
                pl.BlockSpec((B, C, tn), lambda i: (0, 0, i)),
                pl.BlockSpec((C, C4), lambda i: (0, 0)),
                pl.BlockSpec((C4, C), lambda i: (0, 0)),
            ],
            out_specs=pl.BlockSpec((B, C), lambda i: (0, 0)),
            scratch_shapes=[pltpu.VMEM((B, C, _LANE), jnp.float32)],
        ),
        compiler_params=pltpu.CompilerParams(
            dimension_semantics=("arbitrary",),
            vmem_limit_bytes=vmem_limit,
        ),
        cost_estimate=pl.CostEstimate(
            flops=int(4 * B * C * C4),
            transcendentals=int(B * C),
            bytes_accessed=int(B * C * Np * dsize + 2 * C * C4 * 4 + B * C * 4),
        ),
    )(x_p, w1t, w2t)

    # Pass 2: pipelined, megacore-parallel broadcast-scale in native dtype.
    out_p = pl.pallas_call(
        _scale_kernel,
        out_shape=jax.ShapeDtypeStruct((B, C, Np), x.dtype),
        grid_spec=pltpu.PrefetchScalarGridSpec(
            num_scalar_prefetch=0,
            grid=(num_tiles,),
            in_specs=[
                pl.BlockSpec((B, C), lambda i: (0, 0)),
                pl.BlockSpec((B, C, tn), lambda i: (0, 0, i)),
            ],
            out_specs=pl.BlockSpec((B, C, tn), lambda i: (0, 0, i)),
        ),
        compiler_params=pltpu.CompilerParams(
            dimension_semantics=("parallel",),
            vmem_limit_bytes=vmem_limit,
        ),
        cost_estimate=pl.CostEstimate(
            flops=int(B * C * Np),
            transcendentals=0,
            bytes_accessed=int(2 * B * C * Np * dsize + B * C * 4),
        ),
    )(gate, x_p)

    return out_p if Np == N else out_p[:, :, :N]


def _reference(x, w1, w2):
    g = jnp.max(x.astype(jnp.float32), axis=-1)                    # (B, C)
    h = jnp.maximum(g @ w1.astype(jnp.float32).T, 0.0)             # (B, C4)
    gate = jax.nn.sigmoid(h @ w2.astype(jnp.float32).T)            # (B, C)
    return (gate[:, :, None] * x.astype(jnp.float32)).astype(x.dtype)


if __name__ == "__main__":
    key = jax.random.PRNGKey(0)
    # Small shapes: channels divisible by count=4; N not a multiple of 128 to
    # exercise the padding path and multiple pipelined grid steps.
    B, C, N = 2, 16, 1500
    C4 = C // 4

    kx, k1, k2 = jax.random.split(key, 3)
    x = jax.random.normal(kx, (B, C, N), dtype=jnp.float32)
    # Deterministic "kaiming-like" init for the 1x1 conv weights (bias=False).
    w1 = jax.random.normal(k1, (C4, C), dtype=jnp.float32) * (2.0 / C) ** 0.5
    w2 = jax.random.normal(k2, (C, C4), dtype=jnp.float32) * (2.0 / C4) ** 0.5

    out = lab_module(x, w1, w2)
    out = jax.block_until_ready(out)

    ref = _reference(x, w1, w2)
    assert out.shape == (B, C, N)
    assert jnp.allclose(out, ref, atol=1e-5, rtol=1e-5), float(
        jnp.max(jnp.abs(out - ref)))

    print("KERNEL_OK")
</pallas_src>

<mosaic_0001>
module attributes {stable_mosaic.version = 11 : i64} {
  func.func @_gate_kernel(%arg0: i32, %arg1: memref<2x16x512xf32, #tpu.memory_space<vmem>>, %arg2: memref<16x4xf32, #tpu.memory_space<vmem>>, %arg3: memref<4x16xf32, #tpu.memory_space<vmem>>, %arg4: memref<2x16xf32, #tpu.memory_space<vmem>>, %arg5: memref<2x16x128xf32, #tpu.memory_space<vmem>>) attributes {dimension_semantics = [#tpu.dimension_semantics<arbitrary>], iteration_bounds = array<i64: 3>, scalar_prefetch = 0 : i64, scratch_operands = 1 : i64, tpu.core_type = #tpu.core_type<tc>, window_params = [{transform_indices = @transform_0, window_bounds = array<i64: 2, 16, 512>}, {pipeline_mode = #tpu.pipeline_mode<synchronous>, transform_indices = @transform_1, window_bounds = array<i64: 16, 4>}, {pipeline_mode = #tpu.pipeline_mode<synchronous>, transform_indices = @transform_2, window_bounds = array<i64: 4, 16>}, {pipeline_mode = #tpu.pipeline_mode<synchronous>, transform_indices = @transform_3, window_bounds = array<i64: 2, 16>}]} {
    %c0_i32 = arith.constant 0 : i32
    %0 = arith.cmpi eq, %arg0, %c0_i32 : i32
    %1 = arith.extui %0 : i1 to i32
    %c0_i32_0 = arith.constant 0 : i32
    %2 = arith.cmpi ne, %1, %c0_i32_0 : i32
    scf.if %2 {
      %cst = arith.constant 0xFF800000 : f32
      %16 = vector.broadcast %cst : f32 to vector<2x16x128xf32>
      %c0_16 = arith.constant 0 : index
      %c0_17 = arith.constant 0 : index
      %c0_18 = arith.constant 0 : index
      %17 = vector.load %arg5[%c0_16, %c0_17, %c0_18] : memref<2x16x128xf32, #tpu.memory_space<vmem>>, vector<2x16x128xf32>
      tpu.vector_store %arg5[%c0_16, %c0_17, %c0_18], %16 {strides = array<i32>} : memref<2x16x128xf32, #tpu.memory_space<vmem>>, vector<2x16x128xf32>,
    } else {
    }
    %c0 = arith.constant 0 : index
    %c0_1 = arith.constant 0 : index
    %c0_2 = arith.constant 0 : index
    %3 = vector.load %arg5[%c0, %c0_1, %c0_2] : memref<2x16x128xf32, #tpu.memory_space<vmem>>, vector<2x16x128xf32>
    %c0_3 = arith.constant 0 : index
    %c0_4 = arith.constant 0 : index
    %c0_5 = arith.constant 0 : index
    %4 = vector.load %arg1[%c0_3, %c0_4, %c0_5] : memref<2x16x512xf32, #tpu.memory_space<vmem>>, vector<2x16x128xf32>
    %5 = arith.maximumf %3, %4 : vector<2x16x128xf32>
    %c0_6 = arith.constant 0 : index
    %c0_7 = arith.constant 0 : index
    %c128 = arith.constant 128 : index
    %6 = vector.load %arg1[%c0_6, %c0_7, %c128] : memref<2x16x512xf32, #tpu.memory_space<vmem>>, vector<2x16x128xf32>
    %7 = arith.maximumf %5, %6 : vector<2x16x128xf32>
    %c0_8 = arith.constant 0 : index
    %c0_9 = arith.constant 0 : index
    %c256 = arith.constant 256 : index
    %8 = vector.load %arg1[%c0_8, %c0_9, %c256] : memref<2x16x512xf32, #tpu.memory_space<vmem>>, vector<2x16x128xf32>
    %9 = arith.maximumf %7, %8 : vector<2x16x128xf32>
    %c0_10 = arith.constant 0 : index
    %c0_11 = arith.constant 0 : index
    %c384 = arith.constant 384 : index
    %10 = vector.load %arg1[%c0_10, %c0_11, %c384] : memref<2x16x512xf32, #tpu.memory_space<vmem>>, vector<2x16x128xf32>
    %11 = arith.maximumf %9, %10 : vector<2x16x128xf32>
    %c0_12 = arith.constant 0 : index
    %c0_13 = arith.constant 0 : index
    %c0_14 = arith.constant 0 : index
    %12 = vector.load %arg5[%c0_12, %c0_13, %c0_14] : memref<2x16x128xf32, #tpu.memory_space<vmem>>, vector<2x16x128xf32>
    tpu.vector_store %arg5[%c0_12, %c0_13, %c0_14], %11 {strides = array<i32>} : memref<2x16x128xf32, #tpu.memory_space<vmem>>, vector<2x16x128xf32>,
    %c2_i32 = arith.constant 2 : i32
    %13 = arith.cmpi eq, %arg0, %c2_i32 : i32
    %14 = arith.extui %13 : i1 to i32
    %c0_i32_15 = arith.constant 0 : i32
    %15 = arith.cmpi ne, %14, %c0_i32_15 : i32
    scf.if %15 {
      %c0_16 = arith.constant 0 : index
      %c0_17 = arith.constant 0 : index
      %c0_18 = arith.constant 0 : index
      %16 = vector.load %arg5[%c0_16, %c0_17, %c0_18] : memref<2x16x128xf32, #tpu.memory_space<vmem>>, vector<2x16x128xf32>
      %cst = arith.constant dense<0xFF800000> : vector<2x16xf32>
      %17 = vector.multi_reduction <maximumf>, %16, %cst [2] : vector<2x16x128xf32> to vector<2x16xf32>
      %c0_19 = arith.constant 0 : index
      %c0_20 = arith.constant 0 : index
      %18 = vector.load %arg2[%c0_19, %c0_20] : memref<16x4xf32, #tpu.memory_space<vmem>>, vector<16x4xf32>
      %cst_21 = arith.constant dense<0.000000e+00> : vector<2x4xf32>
      %19 = tpu.matmul %17, %18, %cst_21 {dimension_numbers = #tpu.dot_dimension_numbers<[1], [0], [0], [1], [0, 0, 1, 1], [], []>} : vector<2x16xf32>, vector<16x4xf32>, vector<2x4xf32> -> vector<2x4xf32>
      %cst_22 = arith.constant 0.000000e+00 : f32
      %20 = vector.broadcast %cst_22 : f32 to vector<2x4xf32>
      %21 = arith.maximumf %19, %20 : vector<2x4xf32>
      %c0_23 = arith.constant 0 : index
      %c0_24 = arith.constant 0 : index
      %22 = vector.load %arg3[%c0_23, %c0_24] : memref<4x16xf32, #tpu.memory_space<vmem>>, vector<4x16xf32>
      %cst_25 = arith.constant dense<0.000000e+00> : vector<2x16xf32>
      %23 = tpu.matmul %21, %22, %cst_25 {dimension_numbers = #tpu.dot_dimension_numbers<[1], [0], [0], [1], [0, 0, 1, 1], [], []>} : vector<2x4xf32>, vector<4x16xf32>, vector<2x16xf32> -> vector<2x16xf32>
      %24 = arith.negf %23 : vector<2x16xf32>
      %25 = math.exp %24 : vector<2x16xf32>
      %cst_26 = arith.constant 1.000000e+00 : f32
      %26 = vector.broadcast %cst_26 : f32 to vector<2x16xf32>
      %27 = arith.addf %26, %25 : vector<2x16xf32>
      %28 = arith.divf %26, %27 : vector<2x16xf32>
      %c0_27 = arith.constant 0 : index
      %c0_28 = arith.constant 0 : index
      %29 = vector.load %arg4[%c0_27, %c0_28] : memref<2x16xf32, #tpu.memory_space<vmem>>, vector<2x16xf32>
      tpu.vector_store %arg4[%c0_27, %c0_28], %28 {strides = array<i32>} : memref<2x16xf32, #tpu.memory_space<vmem>>, vector<2x16xf32>,
    } else {
    }
    return
  }
  func.func @transform_0(%arg0: i32) -> (i32, i32, i32) {
    %c0_i32 = arith.constant 0 : i32
    %c0_i32_0 = arith.constant 0 : i32
    %c0_i32_1 = arith.constant 0 : i32
    return %c0_i32, %c0_i32_0, %arg0 : i32, i32, i32
  }
  func.func @transform_1(%arg0: i32) -> (i32, i32) {
    %c0_i32 = arith.constant 0 : i32
    %c0_i32_0 = arith.constant 0 : i32
    %c0_i32_1 = arith.constant 0 : i32
    return %c0_i32, %c0_i32_0 : i32, i32
  }
  func.func @transform_2(%arg0: i32) -> (i32, i32) {
    %c0_i32 = arith.constant 0 : i32
    %c0_i32_0 = arith.constant 0 : i32
    %c0_i32_1 = arith.constant 0 : i32
    return %c0_i32, %c0_i32_0 : i32, i32
  }
  func.func @transform_3(%arg0: i32) -> (i32, i32) {
    %c0_i32 = arith.constant 0 : i32
    %c0_i32_0 = arith.constant 0 : i32
    %c0_i32_1 = arith.constant 0 : i32
    return %c0_i32, %c0_i32_0 : i32, i32
  }
}

</mosaic_0001>

<bundles_post_ra>
// kernel: tpu_custom_call.1
= control target key start
LH: loop header
LB: loop body
LE: loop exit
PB: predicated region body
PF: predicated region fallthrough
CT: control target
= control target key end

     0   :  { %8 = vsyncpa [#allocation4], 0  ;;  %s837_s0 = inlined_call_operand.hbm [shape: f32[2,16,1536], index: 0, kind: input, shape index: {}]   ;;  %s838_s1 = inlined_call_operand.vmem [shape: f32[16,4], index: 1, kind: input, shape index: {}]   ;;  %s839_s2 = inlined_call_operand.vmem [shape: f32[4,16], index: 2, kind: input, shape index: {}]   ;;  %s840_s3 = inlined_call_operand.hbm [shape: f32[2,16], index: 3, kind: output, shape index: {}]  }
   0x1   :  { %10 = vsyncpa [#allocation4 + $0x1], 0 }
   0x2   :  { %11 = vsyncpa [#allocation5], 0  ;;  %s702_s12 = smov 0   ;;  %s704_s13 = smov 0  }
   0x3   :  { %s706_s14 = smov 0   ;;  %s708_s15 = smov 0  }
   0x4 LB: > { %s721_s16 = sadd.s32 4294967295, %s672_s15   ;;  %s724_s17 = sadd.s32 1, %s672_s15   ;;  %s672_s15 = sphi %s708_s15, %s848_s15   ;;  %s668_s14 = sphi %s706_s14, %s847_s14   ;;  %s664_s13 = sphi %s704_s13, %s846_s13   ;;  %s660_s12 = sphi %s702_s12, %s845_s12  }
   0x5   : > { %s21_s18 = ssub.s32 %s672_s15, %s724_s17  ;;  %s24_s19 = sadd.s32 1, %s668_s14 }
   0x6   : > { %p22_p0 = scmp.eq.s32.totalorder %s21_s18, 0  ;;  %p31_p1 = scmp.ne.s32.totalorder %s668_s14, %s664_s13 }
   0x7   : > { %p32_p2 = scmp.eq.s32.totalorder %s672_s15, 0  ;;  %p37_p3 = scmp.ne.s32.totalorder %s664_s13, %s660_s12 }
   0x8   : > { %s734_s20 = scalar_select %p22_p0, %s668_s14, %s24_s19  }
   0x9   : > { %p33_p4 = por %p32_p2, %p31_p1  ;;  %p38_p5 = scmp.eq.s32.totalorder %s721_s16, 0 }
   0xa   : > { %p536_p6 = scmp.lt.s32.totalorder %s672_s15, 3  ;;  %s130_s22 = sand.u32 1, %s668_s14  }
   0xb   : > { %p738_p7 = por %p38_p5, %p37_p3  ;;  %s493_s23 = sshll.u32 %s130_s22, 7 }
   0xc   : > { %s508_s24 = sshll.u32 %s672_s15, 9  ;;  %s134_s28 = scalar_lea.vmem [#allocation3], %s493_s23 }
   0xd   : > { %s842_s21 = scalar_select %p738_p7, 1, 0 }
   0xe   : > { %s747_s27 = scalar_lea.hbm %s837_s0, %s508_s24  ;;  %s141_s29 = sshll.u32 %s134_s28, 4  ;;  %s749_s29 = int_to_ptr.vmem [resolvable:$true] %s141_s29 }
   0xf   : > { %p751_p8 = pnand %p536_p6, %p33_p4  ;;  %s755_s4 = scalar_lea.sflag [#allocation4], %s130_s22 }
  0x10   : > { %s582_s5 = scalar_lea.hbm %s747_s27, 2048  ;;  %s587_s8 = scalar_lea.hbm %s837_s0, 6144 }
  0x11   : > { %p583_p9 = scmp.ne.s32.totalorder %s747_s27, %s582_s5  ;;  %p584_p10 = pneg %p751_p8 }
  0x12   : > { %p588_p13 = scmp.lt.s32.totalorder %s747_s27, %s837_s0  ;;  %p589_p0 = scmp.lt.s32.totalorder %s587_s8, %s582_s5 }
  0x13   : > { %p585_p11 = pnand %p584_p10, %p583_p9 }
  0x14   : > { %p590_p1 = por %p589_p0, %p588_p13 }
  0x15   : > { %p586_p12 = pneg %p585_p11 }
  0x17   : > { %p591_p2 = pnand %p590_p1, %p586_p12 }
  0x19   : > { %594 = shalt.err (!%p591_p2)
}
  0x1a   : > { %s595_s11 = scalar_lea.vmem %s749_s29, 2048  ;;  %s674_s12 = smov [#allocation3]  }
  0x1b   : > { %p596_p3 = scmp.ne.s32.totalorder %s749_s29, %s595_s11  ;;  %s600_s18 = sshll.u32 %s674_s12, 4  ;;  %s601_s18 = int_to_ptr.vmem [resolvable:$false] %s600_s18 }
  0x1c   : > { %s602_s19 = scalar_lea.vmem %s601_s18, 4096  ;;  %p603_p6 = scmp.lt.s32.totalorder %s749_s29, %s601_s18 }
  0x1d   : > { %p598_p4 = pnand %p596_p3, %p584_p10  ;;  %p604_p9 = scmp.lt.s32.totalorder %s602_s19, %s595_s11 }
  0x1f   : > { %p599_p5 = pneg %p598_p4  ;;  %p605_p11 = por %p604_p9, %p603_p6 }
  0x21   : > { %p606_p7 = pnand %p605_p11, %p599_p5 }
  0x23   : > { %609 = shalt.err (!%p606_p7)
}
  0x24   : > { %s675_s22 = smov 1536   ;;  %s676_s23 = smov 512  }
  0x25   : > { %s677_s24 = smov 32   ;;  %p496_p10 = scmp.ge.s32.totalorder %s672_s15, 1 }
  0x26   : > { %535 = dma.hbm_to_vmem [thread:$0]  (!%p751_p8), %s747_s27, 2048, %s749_s29, %s755_s4, %s675_s22, %s676_s23, %s677_s24  }
  0x27   : > { %p149_p12 = scmp.lt.s32.totalorder %s672_s15, 4 }
  0x29   : > { %p150_p13 = pnand %p496_p10, %p149_p12 }
  0x2a   : > { %s155_s25 = sand.u32 (!%p150_p13), 1, %s664_s13   ;;  %p844_p7 = scmp.ne.s32.totalorder (!%p150_p13), %s842_s21, 0 }
  0x2b   : > { %153 = sbr.rel (%p150_p13) target bundleno = 664 (0x298), region = 32  ;;  %s497_s26 = sshll.u32 (!%p150_p13), %s155_s25, 7 }
  0x2c   : > { %s156_s28 = scalar_lea.sflag (!%p150_p13), [#allocation4], %s155_s25  ;;  %s779_s5 = scalar_lea.vmem (!%p150_p13), [#allocation3], %s497_s26 }
  0x30   : > { %651 = dma.done.wait (%p844_p7), %s156_s28, 2048  }
  0x31   : > { %653 = vsyncadd (%p844_p7), %s156_s28, 4294965248  ;;  %p498_p0 = scmp.ne.s32.totalorder %s721_s16, 0 }
  0x33   : > { %181 = sbr.rel (%p498_p0) target bundleno = 59 (0x3b), region = 40 }
  0x38   : > { %v678_v0 = vmov -inf  }
  0x39   : > { %182 = vst [vmem:[#allocation2 + $0x10] sm:$0xff] %v678_v0  ;;  %183 = vst [vmem:[#allocation2] sm:$0xff] %v678_v0 }
  0x3a   : > { %184 = vst [vmem:[#allocation2 + $0x18] sm:$0xff] %v678_v0  ;;  %185 = vst [vmem:[#allocation2 + $0x8] sm:$0xff] %v678_v0 }
  0x3b PF: > { %v190_v2 = vld [vmem:[%s779_s5] sm:$0xff]  ;;  %v198_v3 = vld [vmem:[%s779_s5 + $0x8] sm:$0xff]  ;;  %v206_v6 = vld [vmem:[%s779_s5 + $0x10] sm:$0xff]  ;;  %p499_p8 = scmp.ne.s32.totalorder %s721_s16, 2 }
  0x3c   : > { %v191_v7 = vld [vmem:[%s779_s5 + $0x20] sm:$0xff]  ;;  %v199_v8 = vld [vmem:[%s779_s5 + $0x28] sm:$0xff]  ;;  %v214_v10 = vld [vmem:[%s779_s5 + $0x18] sm:$0xff] }
  0x3d   : > { %v192_v13 = vld [vmem:[%s779_s5 + $0x40] sm:$0xff]  ;;  %v207_v14 = vld [vmem:[%s779_s5 + $0x30] sm:$0xff]  ;;  %v200_v16 = vld [vmem:[%s779_s5 + $0x48] sm:$0xff] }
  0x3e   : > { %v208_v17 = vld [vmem:[%s779_s5 + $0x50] sm:$0xff]  ;;  %v193_v21 = vld [vmem:[%s779_s5 + $0x60] sm:$0xff]  ;;  %v201_v22 = vld [vmem:[%s779_s5 + $0x68] sm:$0xff] }
  0x3f   : > { %v215_v23 = vld [vmem:[%s779_s5 + $0x38] sm:$0xff]  ;;  %v209_v29 = vld [vmem:[%s779_s5 + $0x70] sm:$0xff] }
  0x40   : > { %v186_v1 = vld [vmem:[#allocation2 + $0x10] sm:$0xff]  ;;  %v187_v5 = vld [vmem:[#allocation2] sm:$0xff]  ;;  %v216_v28 = vld [vmem:[%s779_s5 + $0x58] sm:$0xff] }
  0x41   : > { %v194_v4 = vmax.f32 %v186_v1, %v190_v2  ;;  %v195_v11 = vmax.f32 %v187_v5, %v191_v7  ;;  %v188_v12 = vld [vmem:[#allocation2 + $0x18] sm:$0xff]  ;;  %v189_v20 = vld [vmem:[#allocation2 + $0x8] sm:$0xff] }
  0x42   : > { %v196_v15 = vmax.f32 %v188_v12, %v192_v13  ;;  %v197_v25 = vmax.f32 %v189_v20, %v193_v21  ;;  %v217_v33 = vld [vmem:[%s779_s5 + $0x78] sm:$0xff] }
  0x43   : > { %v202_v9 = vmax.f32 %v194_v4, %v198_v3  ;;  %v203_v19 = vmax.f32 %v195_v11, %v199_v8 }
  0x44   : > { %v204_v24 = vmax.f32 %v196_v15, %v200_v16  ;;  %v205_v31 = vmax.f32 %v197_v25, %v201_v22 }
  0x45   : > { %v210_v18 = vmax.f32 %v202_v9, %v206_v6  ;;  %v211_v27 = vmax.f32 %v203_v19, %v207_v14 }
  0x46   : > { %v212_v30 = vmax.f32 %v204_v24, %v208_v17  ;;  %v213_v35 = vmax.f32 %v205_v31, %v209_v29  ;;  %229 = sbr.rel (%p499_p8) target bundleno = 649 (0x289), region = 44 }
  0x47   : > { %v218_v26 = vmax.f32 %v210_v18, %v214_v10  ;;  %v219_v32 = vmax.f32 %v211_v27, %v215_v23 }
  0x48   : > { %v220_v34 = vmax.f32 %v212_v30, %v216_v28  ;;  %v221_v36 = vmax.f32 %v213_v35, %v217_v33 }
  0x49   : > { %222 = vst [vmem:[#allocation2 + $0x10] sm:$0xff] %v218_v26  ;;  %223 = vst [vmem:[#allocation2] sm:$0xff] %v219_v32 }
  0x4a   : > { %224 = vst [vmem:[#allocation2 + $0x18] sm:$0xff] %v220_v34  ;;  %225 = vst [vmem:[#allocation2 + $0x8] sm:$0xff] %v221_v36 }
  0x4b   : > { %v679_v41 = vmov 0.0   ;;  %v243_v42 = vld [vmem:[%s838_s1 + $0x8] sm:$0xff]  ;;  %v242_v43 = vld [vmem:[%s838_s1] sm:$0xff]  ;;  %vm680_vm0 = vmmov 0   ;;  %v248_v44 = vlaneseq  ;;  %vm259_vm1 = vcmask 130112  }
  0x4c   : > { %514 = vmatprep.subr.mxu0 %v679_v41  ;;  %521 = vmatprep.subr.mxu1 %v679_v41  ;;  %vm270_vm2 = vcmask 1041409   ;;  %vm272_vm3 = vcmask 130048   ;;  %v346_v61 = vld [vmem:[%s839_s2] sm:$0xf]  ;;  %vm351_vm4 = vcmask 1043456   ;;  %vm347_vm5 = vcmask 31744  }
  0x4d   : > { %515 = vmatpush3.msra.mxu0 %v243_v42  ;;  %518 = vmatprep.mubr.msk.f32.mxu0 %vm680_vm0, %v679_v41  ;;  %v249_v45 = vand.u32 127, %v248_v44  ;;  %v251_v46 = vshrl.u32 %v248_v44, 7  ;;  %vm431_vm6 = vcmask 123904  }
  0x4e   : > { %516 = vmatprep.subr.mxu0 %v679_v41  ;;  %523 = vmatprep.mubr.msk.f32.mxu1 %vm680_vm0, %v679_v41 }
  0x4f   : > { %517 = vmatpush3.msra.mxu0 %v242_v43  ;;  %v254_v47 = vadd.s32 4294967288, %v249_v45  ;;  %v252_v50 = vsub.s32 %v249_v45, %v251_v46  ;;  %522 = vmatpush3.msk.msra.mxu1 %vm351_vm4, %v346_v61 }
  0x50   : > { %v230_v38 = vld [vmem:[#allocation2 + $0x10] sm:$0xff]  ;;  %v231_v40 = vld [vmem:[#allocation2] sm:$0xff] }
  0x51   : > { %v232_v37 = vld [vmem:[#allocation2 + $0x18] sm:$0xff]  ;;  %234 = vmax.xlane.f32.xlu0 %v230_v38  ;;  %v233_v39 = vld [vmem:[#allocation2 + $0x8] sm:$0xff]  ;;  %v257_v51 = vsub.s32 %v254_v47, %v251_v46 }
  0x52   : > { %238 = vmax.xlane.f32.xlu1 %v232_v37 }
  0x55   : > { %236 = vmax.xlane.f32.xlu0 %v231_v40 }
  0x56   : > { %240 = vmax.xlane.f32.xlu1 %v233_v39 }
  0xda   : > { %v235_v49 = vpop.xlane.xlu0 %234 }
  0xdb   : > { %v239_v48 = vpop.xlane.xlu1 %238  ;;  %v253_v55 = vrot.slane %v235_v49, %v252_v50 }
  0xdc   : > { %v264_v54 = vrot.slane %v239_v48, %v252_v50 }
  0xde   : > { %v237_v53 = vpop.xlane.xlu0 %236 }
  0xdf   : > { %v241_v52 = vpop.xlane.xlu1 %240  ;;  %v258_v57 = vrot.slane %v237_v53, %v257_v51 }
  0xe0   : > { %v268_v56 = vrot.slane %v241_v52, %v257_v51 }
  0xe1   : > { %v260_v59 = vsel %vm259_vm1, %v258_v57, %v253_v55 }
  0xe2   : > { %v269_v58 = vsel %vm259_vm1, %v268_v56, %v264_v54 }
  0xe3   : > { %v271_v60 = vsel %vm270_vm2, %v269_v58, %v260_v59 }
  0xe4   : > { %519 = vmatmul.mubr.msk.f32.vlgmr.msra.gmra.mxu0 %vm272_vm3, %v271_v60 }
 0x1a4   : > { %v341_v62 = vpop.f32.mrf.mxu0 }
 0x1a5   : > { %v345_v63 = vmax.f32 %v341_v62, 0.0 }
 0x1a6   : > { %v520_v0 = vpop.f32.mrf.mxu0 }
 0x1a7   : > { %524 = vmatmul.mubr.msk.f32.vlgmr.msra.gmra.mxu1 %vm347_vm5, %v345_v63 }
 0x267   : > { %v421_v1 = vpop.f32.mrf.mxu1 }
 0x268   : > { %v503_v2 = vmul.f32 -1.442695, %v421_v1 }
 0x269   : > { %v525_v3 = vpop.f32.mrf.mxu1 }
 0x26a   : > { %578 = vpow2.f32 %v503_v2 }
 0x277   : > { %v579_v4 = vpop.eup %578 }
 0x278   : > { %v428_v5 = vadd.f32 1.0, %v579_v4 }
 0x27a   : > { %580 = vrcp.f32 %v428_v5 }
 0x287   : > { %v581_v6 = vpop.eup %580 }
 0x288   : > { %432 = vst.msk [vmem:[#allocation6] sm:$0x3] %vm431_vm6, %v581_v6 }
 0x289 PF: > { %p537_p1 = scmp.eq.s32.totalorder %s721_s16, 2  ;;  %s681_s6 = smov [#allocation6]  }
 0x28a   : > { %s440_s7 = sshll.u32 %s681_s6, 4  ;;  %s441_s7 = int_to_ptr.vmem [resolvable:$true] %s440_s7 }
 0x28b   : > { %s610_s8 = scalar_lea.vmem %s441_s7, 32  ;;  %p617_p5 = scmp.lt.s32.totalorder %s441_s7, %s441_s7 }
 0x28c   : > { %p611_p2 = scmp.ne.s32.totalorder %s441_s7, %s610_s8  ;;  %p618_p6 = scmp.lt.s32.totalorder %s610_s8, %s610_s8 }
 0x28e   : > { %p612_p3 = pnand %p611_p2, %p537_p1  ;;  %p619_p9 = por %p618_p6, %p617_p5 }
 0x290   : > { %p613_p4 = pneg %p612_p3 }
 0x292   : > { %p620_p11 = pnand %p619_p9, %p613_p4 }
 0x294   : > { %623 = shalt.err (!%p620_p11)
}
 0x295   : > { %529 = dma.vmem_to_hbm [thread:$0]  (%p537_p1), %s441_s7, 32, %s840_s3, [#allocation5]  }
 0x296   : > { %655 = dma.done.wait (%p537_p1), [#allocation5], 32  }
 0x297   : > { %657 = vsyncadd (%p537_p1), [#allocation5], 4294967264 }
 0x298 PF: > { %p14_p10 = scmp.ge.s32.totalorder %s724_s17, 5   ;;  %s845_s12 = smov %s664_s13 }
 0x299   : > { %s846_s13 = smov %s668_s14  ;;  %s847_s14 = smov %s734_s20 }
 0x29a   : > { %s848_s15 = smov %s724_s17  ;;  %16 = sbr.rel (!%p14_p10) target bundleno = 4 (0x4), region = 77 }
 0x29f   :  { %453 = vsyncpa [#allocation4], 1 }
 0x2a0   :  { %455 = vsyncpa [#allocation4 + $0x1], 1 }
 0x2a1   :  { %456 = vsyncpa [#allocation5], 1 }
 0x2a2   :  { %458 = vsyncpa [#allocation5 + $0x1], 1 }

</bundles_post_ra>
